<compile_context>
chip_gen: v5e
topology: v5e:2x2
jax: 0.10.0
libtpu: 0.0.40
codegen_flags: <defaults>
</compile_context>

<pallas_src>
import jax
import jax.numpy as jnp
from jax import lax
from jax.experimental import pallas as pl
from jax.experimental.pallas import tpu as pltpu


def _data_to_pd_kernel(x_ref, mask_ref, w_enc_ref, b_enc_ref,
                       w_dec_ref, b_dec_ref, o_ref):
    # x_ref    : (TM, D_in)  bf16   flattened (B*T, D_in) row tile
    # mask_ref : (TM, 1)     bf16   per-token mask
    # w_enc_ref: (D_in, H)   bf16 ; b_enc_ref: (1, H)     f32
    # w_dec_ref: (H, D_out)  bf16 ; b_dec_ref: (1, D_out) f32
    # o_ref    : (TM, D_out) f32
    x = x_ref[...]

    # ---- encoder_data(X, dumb_mask):  tanh(X @ W_enc + b_enc) ----
    # bf16 MXU inputs, f32 accumulation; tanh in f32 (v5e-safe).
    h = jnp.dot(x, w_enc_ref[...], preferred_element_type=jnp.float32)
    h = jnp.tanh(h + b_enc_ref[...])

    # ---- decoder_pd(z_enc, T, mask):  z_enc @ W_dec + b_dec ----
    z = jnp.dot(h.astype(jnp.bfloat16), w_dec_ref[...],
                preferred_element_type=jnp.float32)
    z = z + b_dec_ref[...]

    # ---- softplus on the first 2 channels, identity on the rest ----
    # Full-width stable softplus + lane select; avoids slice/concat relayouts.
    col = lax.broadcasted_iota(jnp.int32, z.shape, 1)
    soft = jnp.maximum(z, 0.0) + jnp.log1p(jnp.exp(-jnp.abs(z)))
    res = jnp.where(col < 2, soft, z)

    # ---- mask broadcast multiply ----
    o_ref[...] = (res * mask_ref[...].astype(jnp.float32)).astype(o_ref.dtype)


def _round_up(x, m):
    return ((x + m - 1) // m) * m


def data_to_pd(X, mask, w_enc, b_enc, w_dec, b_dec, *, block_m=4096):
    """X: (B, T, D_in), mask: (B, T) -> (B, T, D_out) float32."""
    B, T, D_in = X.shape
    H = w_enc.shape[1]
    D_out = w_dec.shape[1]
    M = B * T

    # Row tile: multiple of 8 (sublane granule), capped by block_m. No input
    # padding: the grid uses cdiv and Pallas clips the ragged final block; tail
    # rows are row-independent garbage and are sliced off after the call.
    TM = min(block_m, _round_up(M, 8))
    grid = (pl.cdiv(M, TM),)

    # Streamed operands in bf16 (halves the dominant HBM read stream).
    x_flat = X.reshape(M, D_in).astype(jnp.bfloat16)
    mask_flat = mask.reshape(M, 1).astype(jnp.bfloat16)

    # MXU weights in bf16; biases stay f32 (added to the f32 accumulators).
    w_enc_b = w_enc.astype(jnp.bfloat16)
    w_dec_b = w_dec.astype(jnp.bfloat16)
    b_enc2 = b_enc.reshape(1, H).astype(jnp.float32)
    b_dec2 = b_dec.reshape(1, D_out).astype(jnp.float32)

    cost = pl.CostEstimate(
        flops=2 * M * (D_in * H + H * D_out),
        transcendentals=M * (H + 2 * D_out),          # tanh + (exp, log1p) epilogue
        bytes_accessed=(2 * M * (D_in + 1)             # bf16 x + mask reads
                        + 4 * M * D_out                # f32 output writes
                        + 2 * (D_in * H + H * D_out)   # bf16 weights
                        + 4 * (H + D_out)),            # f32 biases
    )

    out_flat = pl.pallas_call(
        _data_to_pd_kernel,
        out_shape=jax.ShapeDtypeStruct((M, D_out), jnp.float32),
        grid=grid,
        in_specs=[
            # streamed per-tile operands (double-buffered by Pallas)
            pl.BlockSpec((TM, D_in), lambda i: (i, 0)),
            pl.BlockSpec((TM, 1), lambda i: (i, 0)),
            # weights / biases: whole-array blocks, constant index map -> resident
            pl.BlockSpec((D_in, H), lambda i: (0, 0)),
            pl.BlockSpec((1, H), lambda i: (0, 0)),
            pl.BlockSpec((H, D_out), lambda i: (0, 0)),
            pl.BlockSpec((1, D_out), lambda i: (0, 0)),
        ],
        out_specs=pl.BlockSpec((TM, D_out), lambda i: (i, 0)),
        compiler_params=pltpu.CompilerParams(
            # M axis is embarrassingly parallel -> v7x can split it over both TCs.
            dimension_semantics=("parallel",),
            # ~10 MiB of double-buffered tiles at TM=4096; 48 MiB gives headroom
            # on v5e/v6e while staying below v7x's 64 MiB physical VMEM.
            vmem_limit_bytes=48 * 1024 * 1024,
        ),
        cost_estimate=cost,
    )(x_flat, mask_flat, w_enc_b, b_enc2, w_dec_b, b_dec2)

    return out_flat[:M].reshape(B, T, D_out)


def _reference(X, mask, w_enc, b_enc, w_dec, b_dec):
    """Plain-JAX f32 reference for correctness check."""
    h = jnp.tanh(jnp.einsum("btd,dh->bth", X, w_enc) + b_enc)
    z = jnp.einsum("bth,ho->bto", h, w_dec) + b_dec
    coords = jax.nn.softplus(z[:, :, :2])
    logits = z[:, :, 2:]
    res = jnp.concatenate([coords, logits], axis=2)
    return res * mask[:, :, None]


def _run_case(key, B, T, D_in, H, D_out, block_m):
    k_x, k_m, k_we, k_be, k_wd, k_bd = jax.random.split(key, 6)
    X = jax.random.normal(k_x, (B, T, D_in), dtype=jnp.float32)
    mask = (jax.random.uniform(k_m, (B, T)) > 0.3).astype(jnp.float32)

    # Deterministic synthetic parameters (no checkpoint loading).
    w_enc = jax.random.normal(k_we, (D_in, H), dtype=jnp.float32) * 0.1
    b_enc = jax.random.normal(k_be, (H,), dtype=jnp.float32) * 0.1
    w_dec = jax.random.normal(k_wd, (H, D_out), dtype=jnp.float32) * 0.1
    b_dec = jax.random.normal(k_bd, (D_out,), dtype=jnp.float32) * 0.1

    out = data_to_pd(X, mask, w_enc, b_enc, w_dec, b_dec, block_m=block_m)
    out = jax.block_until_ready(out)

    ref = _reference(X, mask, w_enc, b_enc, w_dec, b_dec)
    assert out.shape == (B, T, D_out)
    # bf16 MXU path vs. f32 reference -> loosened tolerance (per review).
    assert jnp.allclose(out, ref, atol=3e-2, rtol=3e-2), \
        float(jnp.max(jnp.abs(out - ref)))


if __name__ == "__main__":
    key = jax.random.PRNGKey(0)
    k1, k2 = jax.random.split(key)

    # Small case: single tile, grid=(1,).
    _run_case(k1, B=2, T=8, D_in=32, H=32, D_out=8, block_m=4096)

    # Larger case exercising a multi-step grid WITH a ragged (partial) final
    # block and no input padding: M = 2000, TM = 512 -> grid = (4,), tail = 464.
    _run_case(k2, B=2, T=1000, D_in=32, H=32, D_out=8, block_m=512)

    print("KERNEL_OK")
</pallas_src>

<mosaic_0001>
module attributes {stable_mosaic.version = 11 : i64} {
  func.func @_data_to_pd_kernel(%arg0: i32, %arg1: memref<16x32xbf16, #tpu.memory_space<vmem>>, %arg2: memref<16x1xbf16, #tpu.memory_space<vmem>>, %arg3: memref<32x32xbf16, #tpu.memory_space<vmem>>, %arg4: memref<1x32xf32, #tpu.memory_space<vmem>>, %arg5: memref<32x8xbf16, #tpu.memory_space<vmem>>, %arg6: memref<1x8xf32, #tpu.memory_space<vmem>>, %arg7: memref<16x8xf32, #tpu.memory_space<vmem>>) attributes {dimension_semantics = [#tpu.dimension_semantics<parallel>], iteration_bounds = array<i64: 1>, scalar_prefetch = 0 : i64, scratch_operands = 0 : i64, tpu.core_type = #tpu.core_type<tc>, window_params = [{transform_indices = @transform_0, window_bounds = array<i64: 16, 32>}, {transform_indices = @transform_1, window_bounds = array<i64: 16, 1>}, {pipeline_mode = #tpu.pipeline_mode<synchronous>, transform_indices = @transform_2, window_bounds = array<i64: 32, 32>}, {pipeline_mode = #tpu.pipeline_mode<synchronous>, transform_indices = @transform_3, window_bounds = array<i64: 1, 32>}, {pipeline_mode = #tpu.pipeline_mode<synchronous>, transform_indices = @transform_4, window_bounds = array<i64: 32, 8>}, {pipeline_mode = #tpu.pipeline_mode<synchronous>, transform_indices = @transform_5, window_bounds = array<i64: 1, 8>}, {transform_indices = @transform_6, window_bounds = array<i64: 16, 8>}]} {
    %c0 = arith.constant 0 : index
    %c0_0 = arith.constant 0 : index
    %0 = vector.load %arg1[%c0, %c0_0] : memref<16x32xbf16, #tpu.memory_space<vmem>>, vector<16x32xbf16>
    %c0_1 = arith.constant 0 : index
    %c0_2 = arith.constant 0 : index
    %1 = vector.load %arg3[%c0_1, %c0_2] : memref<32x32xbf16, #tpu.memory_space<vmem>>, vector<32x32xbf16>
    %cst = arith.constant dense<0.000000e+00> : vector<16x32xf32>
    %2 = tpu.matmul %0, %1, %cst {dimension_numbers = #tpu.dot_dimension_numbers<[1], [0], [0], [1], [0, 0, 1, 1], [], []>} : vector<16x32xbf16>, vector<32x32xbf16>, vector<16x32xf32> -> vector<16x32xf32>
    %c0_3 = arith.constant 0 : index
    %c0_4 = arith.constant 0 : index
    %3 = vector.load %arg4[%c0_3, %c0_4] : memref<1x32xf32, #tpu.memory_space<vmem>>, vector<1x32xf32>
    %4 = vector.broadcast %3 : vector<1x32xf32> to vector<16x32xf32>
    %5 = arith.addf %2, %4 : vector<16x32xf32>
    %6 = math.tanh %5 : vector<16x32xf32>
    %7 = arith.truncf %6 : vector<16x32xf32> to vector<16x32xbf16>
    %c0_5 = arith.constant 0 : index
    %c0_6 = arith.constant 0 : index
    %8 = vector.load %arg5[%c0_5, %c0_6] : memref<32x8xbf16, #tpu.memory_space<vmem>>, vector<32x8xbf16>
    %cst_7 = arith.constant dense<0.000000e+00> : vector<16x8xf32>
    %9 = tpu.matmul %7, %8, %cst_7 {dimension_numbers = #tpu.dot_dimension_numbers<[1], [0], [0], [1], [0, 0, 1, 1], [], []>} : vector<16x32xbf16>, vector<32x8xbf16>, vector<16x8xf32> -> vector<16x8xf32>
    %c0_8 = arith.constant 0 : index
    %c0_9 = arith.constant 0 : index
    %10 = vector.load %arg6[%c0_8, %c0_9] : memref<1x8xf32, #tpu.memory_space<vmem>>, vector<1x8xf32>
    %11 = vector.broadcast %10 : vector<1x8xf32> to vector<16x8xf32>
    %12 = arith.addf %9, %11 : vector<16x8xf32>
    %13 = tpu.iota {dimensions = array<i32: 1>} : vector<16x8xi32>
    %cst_10 = arith.constant 0.000000e+00 : f32
    %14 = vector.broadcast %cst_10 : f32 to vector<16x8xf32>
    %15 = arith.maximumf %12, %14 : vector<16x8xf32>
    %16 = math.absf %12 : vector<16x8xf32>
    %cst_11 = arith.constant 0.000000e+00 : f32
    %17 = vector.broadcast %cst_11 : f32 to vector<16x8xf32>
    %18 = arith.subf %17, %16 : vector<16x8xf32>
    %19 = math.exp %18 : vector<16x8xf32>
    %20 = math.log1p %19 : vector<16x8xf32>
    %21 = arith.addf %15, %20 : vector<16x8xf32>
    %c2_i32 = arith.constant 2 : i32
    %22 = vector.broadcast %c2_i32 : i32 to vector<16x8xi32>
    %23 = arith.cmpi slt, %13, %22 : vector<16x8xi32>
    %24 = arith.select %23, %21, %12 : vector<16x8xi1>, vector<16x8xf32>
    %c0_12 = arith.constant 0 : index
    %c0_13 = arith.constant 0 : index
    %25 = vector.load %arg2[%c0_12, %c0_13] : memref<16x1xbf16, #tpu.memory_space<vmem>>, vector<16x1xbf16>
    %26 = arith.extf %25 : vector<16x1xbf16> to vector<16x1xf32>
    %27 = vector.broadcast %26 : vector<16x1xf32> to vector<16x8xf32>
    %28 = arith.mulf %24, %27 : vector<16x8xf32>
    %c0_14 = arith.constant 0 : index
    %c0_15 = arith.constant 0 : index
    %29 = vector.load %arg7[%c0_14, %c0_15] : memref<16x8xf32, #tpu.memory_space<vmem>>, vector<16x8xf32>
    tpu.vector_store %arg7[%c0_14, %c0_15], %28 {strides = array<i32>} : memref<16x8xf32, #tpu.memory_space<vmem>>, vector<16x8xf32>,
    return
  }
  func.func @transform_0(%arg0: i32) -> (i32, i32) {
    %c0_i32 = arith.constant 0 : i32
    %c0_i32_0 = arith.constant 0 : i32
    return %arg0, %c0_i32 : i32, i32
  }
  func.func @transform_1(%arg0: i32) -> (i32, i32) {
    %c0_i32 = arith.constant 0 : i32
    %c0_i32_0 = arith.constant 0 : i32
    return %arg0, %c0_i32 : i32, i32
  }
  func.func @transform_2(%arg0: i32) -> (i32, i32) {
    %c0_i32 = arith.constant 0 : i32
    %c0_i32_0 = arith.constant 0 : i32
    %c0_i32_1 = arith.constant 0 : i32
    return %c0_i32, %c0_i32_0 : i32, i32
  }
  func.func @transform_3(%arg0: i32) -> (i32, i32) {
    %c0_i32 = arith.constant 0 : i32
    %c0_i32_0 = arith.constant 0 : i32
    %c0_i32_1 = arith.constant 0 : i32
    return %c0_i32, %c0_i32_0 : i32, i32
  }
  func.func @transform_4(%arg0: i32) -> (i32, i32) {
    %c0_i32 = arith.constant 0 : i32
    %c0_i32_0 = arith.constant 0 : i32
    %c0_i32_1 = arith.constant 0 : i32
    return %c0_i32, %c0_i32_0 : i32, i32
  }
  func.func @transform_5(%arg0: i32) -> (i32, i32) {
    %c0_i32 = arith.constant 0 : i32
    %c0_i32_0 = arith.constant 0 : i32
    %c0_i32_1 = arith.constant 0 : i32
    return %c0_i32, %c0_i32_0 : i32, i32
  }
  func.func @transform_6(%arg0: i32) -> (i32, i32) {
    %c0_i32 = arith.constant 0 : i32
    %c0_i32_0 = arith.constant 0 : i32
    return %arg0, %c0_i32 : i32, i32
  }
}

</mosaic_0001>

<bundles_post_ra>
// kernel: tpu_custom_call.1
= control target key start
LH: loop header
LB: loop body
LE: loop exit
PB: predicated region body
PF: predicated region fallthrough
CT: control target
= control target key end

     0   :  { %vm51_vm0 = vcmask 261120   ;;  %v219_v6 = vmov 0   ;;  %v109_v32 = vlaneseq  ;;  %vm160_vm3 = vcmask 64512   ;;  %s289_s2 = inlined_call_operand.vmem [shape: bf16[32,32], index: 2, kind: input, shape index: {}]   ;;  %s290_s3 = inlined_call_operand.vmem [shape: f32[1,32], index: 3, kind: input, shape index: {}]   ;;  %s291_s0 = inlined_call_operand.vmem [shape: bf16[16,32], index: 0, kind: input, shape index: {}]   ;;  %s292_s5 = inlined_call_operand.vmem [shape: f32[1,8], index: 5, kind: input, shape index: {}]   ;;  %s293_s4 = inlined_call_operand.vmem [shape: bf16[32,8], index: 4, kind: input, shape index: {}]   ;;  %s294_s1 = inlined_call_operand.vmem [shape: bf16[16,1], index: 1, kind: input, shape index: {}]   ;;  %s295_s6 = inlined_call_operand.vmem [shape: f32[16,8], index: 6, kind: output, shape index: {}]  }
   0x1   :  { %v191_v0 = vld [vmem:[%s289_s2 + $0x8] sm:$0xff]  ;;  %v190_v1 = vld [vmem:[%s289_s2] sm:$0xff]  ;;  %199 = vset.pattern.permute.xlu0 %v219_v6 }
   0x2   :  { %61 = vmatpush.bf16.msra.mxu0 %v191_v0  ;;  %v189_v2 = vld [vmem:[%s291_s0] sm:$0xff]  ;;  %v193_v3 = vld [vmem:[%s293_s4 + $0x8] sm:$0xff]  ;;  %v110_v36 = vand.u32 127, %v109_v32 }
   0x3   :  { %101 = vmatpush.bf16.msra.mxu1 %v193_v3  ;;  %v192_v4 = vld [vmem:[%s293_s4] sm:$0xff] }
   0x4   :  { %v195_v5 = vld [vmem:[%s294_s1] sm:$0xff]   ;;  %vm141_vm2 = vcmp.lt.s32.totalorder %v110_v36, 2 }
   0x5   :  { %v196_v7 = vunpack.c.l.bf16 %v195_v5  ;;  %v197_v8 = vunpack.c.h.bf16 %v195_v5  ;;  %v205_v11 = vld [vmem:[%s290_s3] ss:$0 sm:$0xff] }
   0x6   :  { %62 = vmatpush.bf16.msra.mxu0 %v190_v1  ;;  %v206_v18 = vld [vmem:[%s292_s5] ss:$0 sm:$0xff] }
   0x7   :  { %102 = vmatpush.bf16.msra.mxu1 %v192_v4  ;;  %v200_v9 = vpack.i.bf16 %v197_v8, %v196_v7 }
   0x9   :  { %179 = vmatmul.msk.bf16.vlgmr.msra.gmra.mxu0 %vm51_vm0, %v189_v2  ;;  %201 = vperm.xlu0 %199, %v200_v9  }
  0x7b   :  { %v202_v39 = vpop.permute.xlu0 %201 }
  0x7c   :  { %v203_v45 = vunpack.i.l.bf16 %v202_v39  ;;  %v204_v56 = vunpack.i.h.bf16 %v202_v39 }
  0x86   :  { %v64_v10 = vpop.f32.mrf.mxu0 }
  0x87   :  { %v65_v12 = vadd.f32 %v205_v11, %v64_v10 }
  0x89   :  { %207 = vtanh.f32 %v65_v12 }
  0x8e   :  { %v66_v13 = vpop.f32.mrf.mxu0 }
  0x8f   :  { %v67_v14 = vadd.f32 %v205_v11, %v66_v13  ;;  %v208_v15 = vpop.eup %207 }
  0x91   :  { %209 = vtanh.f32 %v67_v14 }
  0x97   :  { %v210_v16 = vpop.eup %209 }
  0x98   :  { %v71_v17 = vpack.c.bf16 %v210_v16, %v208_v15 }
  0x9a   :  { %188 = vmatmul.msk.bf16.vlgmr.msra.gmra.mxu1 %vm51_vm0, %v71_v17 }
 0x117   :  { %v104_v19 = vpop.f32.mrf.mxu1 }
 0x118   :  { %v105_v20 = vadd.f32 %v206_v18, %v104_v19 }
 0x11a   :  { %v113_v21 = vand.u32 2147483647, %v105_v20  ;;  %v111_v43 = vmax.f32 %v105_v20, 0.0 }
 0x11c   :  { %v115_v22 = vsub.f32 0.0, %v113_v21 }
 0x11e   :  { %v117_v23 = vmul.f32 1.442695, %v115_v22 }
 0x11f   :  { %v106_v24 = vpop.f32.mrf.mxu1 }
 0x120   :  { %211 = vpow2.f32 %v117_v23  ;;  %v107_v25 = vadd.f32 %v206_v18, %v106_v24 }
 0x122   :  { %v114_v26 = vand.u32 2147483647, %v107_v25  ;;  %v112_v54 = vmax.f32 %v107_v25, 0.0 }
 0x124   :  { %v116_v27 = vsub.f32 0.0, %v114_v26 }
 0x126   :  { %v212_v28 = vpop.eup %211  ;;  %v119_v29 = vmul.f32 1.442695, %v116_v27 }
 0x127   :  { %v121_v30 = vadd.f32 1.0, %v212_v28  ;;  %v124_v31 = vmul.f32 -0.5, %v212_v28  ;;  %v127_v34 = vand.u32 2147483647, %v212_v28 }
 0x128   :  { %213 = vpow2.f32 %v119_v29 }
 0x129   :  { %215 = vlog2.f32 %v121_v30  ;;  %v125_v33 = vadd.f32 1.0, %v124_v31  ;;  %vm128_vm1 = vcmp.lt.f32.partialorder %v127_v34, 0.0004427343 }
 0x12b   :  { %v126_v41 = vmul.f32 %v212_v28, %v125_v33 }
 0x12e   :  { %v214_v35 = vpop.eup %213 }
 0x12f   :  { %v216_v37 = vpop.eup %215  ;;  %v130_v38 = vadd.f32 1.0, %v214_v35  ;;  %v133_v42 = vmul.f32 -0.5, %v214_v35  ;;  %v136_v48 = vand.u32 2147483647, %v214_v35 }
 0x130   :  { %v123_v40 = vmul.f32 0.6931472, %v216_v37 }
 0x131   :  { %217 = vlog2.f32 %v130_v38  ;;  %v134_v47 = vadd.f32 1.0, %v133_v42  ;;  %vm137_vm4 = vcmp.lt.f32.partialorder %v136_v48, 0.0004427343 }
 0x132   :  { %v129_v44 = vsel %vm128_vm1, %v126_v41, %v123_v40 }
 0x133   :  { %v139_v46 = vadd.f32 %v129_v44, %v111_v43  ;;  %v135_v53 = vmul.f32 %v214_v35, %v134_v47 }
 0x135   :  { %v142_v49 = vsel %vm141_vm2, %v139_v46, %v105_v20 }
 0x136   :  { %v158_v50 = vmul.f32 %v203_v45, %v142_v49 }
 0x137   :  { %v218_v51 = vpop.eup %217 }
 0x138   :  { %v132_v52 = vmul.f32 0.6931472, %v218_v51  ;;  %161 = vst.msk [vmem:[%s295_s6] sm:$0xff] %vm160_vm3, %v158_v50 }
 0x13a   :  { %v138_v55 = vsel %vm137_vm4, %v135_v53, %v132_v52 }
 0x13b   :  { %v140_v57 = vadd.f32 %v138_v55, %v112_v54 }
 0x13d   :  { %v143_v58 = vsel %vm141_vm2, %v140_v57, %v107_v25 }
 0x13e   :  { %v159_v59 = vmul.f32 %v204_v56, %v143_v58 }
 0x140   :  { %162 = vst.msk [vmem:[%s295_s6 + $0x8] sm:$0xff] %vm160_vm3, %v159_v59 }

</bundles_post_ra>
